<compile_context>
chip_gen: v6e
topology: v6e:2x2x1
jax: 0.10.0
libtpu: 0.0.40
codegen_flags: <defaults>
</compile_context>

<pallas_src>
import functools

import jax
import jax.numpy as jnp
from jax import lax
from jax.experimental import pallas as pl
from jax.experimental.pallas import tpu as pltpu


# ---------------------------------------------------------------------------
# Single-pass kernel: a whole (Bt, C, HW) slab is VMEM resident.
# ---------------------------------------------------------------------------
def _se_fused_kernel(x_ref, w1t_ref, b1_ref, w2t_ref, b2_ref, o_ref, *, inv_hw):
    # --- squeeze: global average pool over the spatial (lane) axis ---
    s = jnp.sum(x_ref[...], axis=2, dtype=jnp.float32) * inv_hw                     # (Bt, C)
    # --- excite: 1x1 conv (C -> Cmid) + ReLU ---
    h = jnp.dot(s, w1t_ref[...], preferred_element_type=jnp.float32) + b1_ref[...]
    h = jnp.maximum(h, 0.0)                                                         # (Bt, Cmid)
    # --- excite: 1x1 conv (Cmid -> C), no activation ---
    e = jnp.dot(h, w2t_ref[...], preferred_element_type=jnp.float32) + b2_ref[...]  # (Bt, C)
    # --- mode='mul': sigmoid gate broadcast over spatial; second read of the ref ---
    gate = jax.nn.sigmoid(e).astype(x_ref.dtype)[:, :, None]                        # (Bt, C, 1)
    o_ref[...] = (gate * x_ref[...]).astype(o_ref.dtype)


# ---------------------------------------------------------------------------
# Two-pass fallback for feature maps too large for a VMEM-resident slab.
# Pass 1: spatial-tiled pool (f32 scratch accumulator) + excite -> gate (B,C,1).
# ---------------------------------------------------------------------------
def _se_gate_kernel(x_ref, w1t_ref, b1_ref, w2t_ref, b2_ref, gate_ref, acc_ref,
                    *, inv_hw, hw_total, t_hw, need_mask):
    hw_i = pl.program_id(1)

    @pl.when(hw_i == 0)
    def _():
        acc_ref[...] = jnp.zeros_like(acc_ref)

    x = x_ref[...]
    if need_mask:
        # Trailing partial spatial tile: zero the out-of-range lanes so they do
        # not pollute the pool sum (padded block contents are unspecified).
        lane = lax.broadcasted_iota(jnp.int32, x.shape, 2)
        x = jnp.where(hw_i * t_hw + lane < hw_total, x, 0)
    acc_ref[...] += jnp.sum(x, axis=2, dtype=jnp.float32)

    @pl.when(hw_i == pl.num_programs(1) - 1)
    def _():
        s = acc_ref[...] * inv_hw                                                   # (1, C)
        h = jnp.dot(s, w1t_ref[...], preferred_element_type=jnp.float32) + b1_ref[...]
        h = jnp.maximum(h, 0.0)
        e = jnp.dot(h, w2t_ref[...], preferred_element_type=jnp.float32) + b2_ref[...]
        gate_ref[...] = jax.nn.sigmoid(e)[:, :, None]                               # (1, C, 1) f32


# Pass 2: gated multiply, spatial-tiled.
def _se_apply_kernel(x_ref, gate_ref, o_ref):
    g = gate_ref[...].astype(x_ref.dtype)                                           # (1, C, 1)
    o_ref[...] = (g * x_ref[...]).astype(o_ref.dtype)


def _plan_single_pass(B, bytes_per_batch, vmem_budget):
    """Largest divisor Bt of B s.t. 2x-in + 2x-out buffering fits the budget and
    (when B >= 2) the grid keeps >= 2 steps for megacore sharding on v7x.
    Returns None if even Bt = 1 does not fit (caller falls back to two passes)."""
    max_bt = int(vmem_budget // (4 * bytes_per_batch))
    if max_bt < 1:
        return None
    best = 1
    for bt in range(1, min(B, max_bt) + 1):
        if B % bt != 0:
            continue
        if B == 1 or B // bt >= 2:
            best = bt
    return best


def squeeze_excite_pallas(x, w1, b1, w2, b2, *,
                          vmem_limit_bytes=48 * 1024 * 1024,
                          force_two_pass=False,
                          spatial_tile=None):
    """x: (B, C, H, W). w1: (Cmid, C), b1: (Cmid, 1), w2: (C, Cmid), b2: (C, 1).

    vmem_limit_bytes: conservative raise valid on v5e/v6e (128 MiB physical) and
    v7x (64 MiB physical); bump toward ~100 MiB on v5e/v6e for very large maps.
    force_two_pass / spatial_tile: testing/override knobs for the fallback path.
    """
    B, C, H, W = x.shape
    HW = H * W
    Cmid = w1.shape[0]
    itemsize = jnp.dtype(x.dtype).itemsize

    # Channels -> sublanes, flattened spatial -> dense lane axis. Contiguous
    # merge of the last two dims: free, no HBM copy. No padding either: a
    # full-extent last-dim block is legal for any HW and Mosaic masks the
    # trailing lanes in both the reduction and the store.
    x2 = x.reshape(B, C, HW)

    # Pre-transpose the tiny weight matrices so the in-kernel matmuls are
    # (b,C)@(C,Cmid) / (b,Cmid)@(Cmid,C) with row-vector biases.
    w1t = w1.T                      # (C, Cmid)
    w2t = w2.T                      # (Cmid, C)
    b1r = b1.reshape(1, Cmid)
    b2r = b2.reshape(1, C)

    # VMEM footprint of one batch element's feature map after (8,128) layout padding.
    c_pad = 8 * pl.cdiv(C, 8)
    hw_pad = 128 * pl.cdiv(HW, 128)
    bytes_per_batch = c_pad * hw_pad * itemsize
    vmem_budget = vmem_limit_bytes - 8 * 1024 * 1024   # headroom: weights / compiler scratch

    bt = None if force_two_pass else _plan_single_pass(B, bytes_per_batch, vmem_budget)

    compiler_params_1d = pltpu.CompilerParams(
        dimension_semantics=("parallel",), vmem_limit_bytes=vmem_limit_bytes)

    if bt is not None:
        # ---------------- single-pass path ----------------
        kernel = functools.partial(_se_fused_kernel, inv_hw=1.0 / HW)
        out = pl.pallas_call(
            kernel,
            out_shape=jax.ShapeDtypeStruct((B, C, HW), x.dtype),
            grid_spec=pl.GridSpec(
                grid=(B // bt,),
                in_specs=[
                    pl.BlockSpec((bt, C, HW), lambda b: (b, 0, 0)),   # x tile (bt batch elems)
                    pl.BlockSpec((C, Cmid), lambda b: (0, 0)),        # w1^T (replicated)
                    pl.BlockSpec((1, Cmid), lambda b: (0, 0)),        # b1
                    pl.BlockSpec((Cmid, C), lambda b: (0, 0)),        # w2^T
                    pl.BlockSpec((1, C), lambda b: (0, 0)),           # b2
                ],
                out_specs=pl.BlockSpec((bt, C, HW), lambda b: (b, 0, 0)),
            ),
            compiler_params=compiler_params_1d,
        )(x2, w1t, b1r, w2t, b2r)
        return out.reshape(B, C, H, W)

    # ---------------- two-pass fallback (huge feature maps) ----------------
    # TODO(synk): if even a (1, C, 128) tile cannot fit VMEM (astronomical C),
    # a channel-tiled variant of the apply pass would also be needed.
    if spatial_tile is not None:
        assert spatial_tile % 128 == 0, "spatial_tile must be a multiple of 128"
        t_hw = spatial_tile
    else:
        t_hw = (vmem_budget // (4 * c_pad * itemsize)) // 128 * 128
    t_hw = int(max(128, min(t_hw, hw_pad)))
    n_hw = pl.cdiv(HW, t_hw)
    need_mask = (HW % t_hw) != 0

    gate_kernel = functools.partial(
        _se_gate_kernel, inv_hw=1.0 / HW, hw_total=HW, t_hw=t_hw, need_mask=need_mask)
    gates = pl.pallas_call(
        gate_kernel,
        out_shape=jax.ShapeDtypeStruct((B, C, 1), jnp.float32),
        grid_spec=pltpu.PrefetchScalarGridSpec(
            num_scalar_prefetch=0,
            grid=(B, n_hw),
            in_specs=[
                pl.BlockSpec((1, C, t_hw), lambda b, s: (b, 0, s)),
                pl.BlockSpec((C, Cmid), lambda b, s: (0, 0)),
                pl.BlockSpec((1, Cmid), lambda b, s: (0, 0)),
                pl.BlockSpec((Cmid, C), lambda b, s: (0, 0)),
                pl.BlockSpec((1, C), lambda b, s: (0, 0)),
            ],
            out_specs=pl.BlockSpec((1, C, 1), lambda b, s: (b, 0, 0)),
            scratch_shapes=[pltpu.VMEM((1, C), jnp.float32)],
        ),
        compiler_params=pltpu.CompilerParams(
            dimension_semantics=("parallel", "arbitrary"),
            vmem_limit_bytes=vmem_limit_bytes,
        ),
    )(x2, w1t, b1r, w2t, b2r)

    out = pl.pallas_call(
        _se_apply_kernel,
        out_shape=jax.ShapeDtypeStruct((B, C, HW), x.dtype),
        grid_spec=pl.GridSpec(
            grid=(B, n_hw),
            in_specs=[
                pl.BlockSpec((1, C, t_hw), lambda b, s: (b, 0, s)),
                pl.BlockSpec((1, C, 1), lambda b, s: (b, 0, 0)),
            ],
            out_specs=pl.BlockSpec((1, C, t_hw), lambda b, s: (b, 0, s)),
        ),
        compiler_params=pltpu.CompilerParams(
            dimension_semantics=("parallel", "parallel"),
            vmem_limit_bytes=vmem_limit_bytes,
        ),
    )(x2, gates)
    return out.reshape(B, C, H, W)


def squeeze_excite_ref(x, w1, b1, w2, b2):
    """Pure-JAX reference replicating the PyTorch forward semantics."""
    s = jnp.mean(x, axis=(2, 3))                            # (B, C)   global avg pool
    h = jnp.maximum(s @ w1.T + b1[:, 0], 0.0)               # (B, Cmid)
    e = h @ w2.T + b2[:, 0]                                 # (B, C)
    gate = jax.nn.sigmoid(e)[:, :, None, None]              # (B, C, 1, 1)
    return gate * x


def _make_case(key, B, C, H, W, ratio=0.5):
    Cmid = int(C * ratio)
    kx, kw1, kb1, kw2, kb2 = jax.random.split(key, 5)
    x = jax.random.normal(kx, (B, C, H, W), dtype=jnp.float32)
    # Conv2d(C, Cmid, kernel_size=1) weights flattened to (Cmid, C); biases as (out, 1).
    w1 = 0.1 * jax.random.normal(kw1, (Cmid, C), dtype=jnp.float32)
    b1 = 0.1 * jax.random.normal(kb1, (Cmid, 1), dtype=jnp.float32)
    w2 = 0.1 * jax.random.normal(kw2, (C, Cmid), dtype=jnp.float32)
    b2 = 0.1 * jax.random.normal(kb2, (C, 1), dtype=jnp.float32)
    return x, w1, b1, w2, b2


if __name__ == "__main__":
    key = jax.random.PRNGKey(0)
    k1, k2, k3 = jax.random.split(key, 3)

    # Case 1: canonical small config, single-pass path, lane-aligned spatial.
    x, w1, b1, w2, b2 = _make_case(k1, B=2, C=4, H=16, W=16)
    out = jax.block_until_ready(squeeze_excite_pallas(x, w1, b1, w2, b2))
    ref = jax.block_until_ready(squeeze_excite_ref(x, w1, b1, w2, b2))
    assert out.shape == x.shape
    assert jnp.allclose(out, ref, atol=1e-5, rtol=1e-5), "case 1 mismatch vs reference"

    # Case 2: non-128-multiple spatial (no wrapper padding), single-pass path.
    x, w1, b1, w2, b2 = _make_case(k2, B=2, C=8, H=10, W=10)
    out = jax.block_until_ready(squeeze_excite_pallas(x, w1, b1, w2, b2))
    ref = jax.block_until_ready(squeeze_excite_ref(x, w1, b1, w2, b2))
    assert jnp.allclose(out, ref, atol=1e-5, rtol=1e-5), "case 2 mismatch vs reference"

    # Case 3: exercise the two-pass spatial-tiled fallback (partial last tile).
    x, w1, b1, w2, b2 = _make_case(k3, B=2, C=16, H=24, W=24)
    out = jax.block_until_ready(
        squeeze_excite_pallas(x, w1, b1, w2, b2, force_two_pass=True, spatial_tile=256))
    ref = jax.block_until_ready(squeeze_excite_ref(x, w1, b1, w2, b2))
    assert jnp.allclose(out, ref, atol=1e-5, rtol=1e-5), "case 3 mismatch vs reference"

    print("KERNEL_OK")
</pallas_src>

<mosaic_0001>
module attributes {stable_mosaic.version = 11 : i64} {
  func.func @_se_fused_kernel(%arg0: i32, %arg1: memref<1x4x256xf32, #tpu.memory_space<vmem>>, %arg2: memref<4x2xf32, #tpu.memory_space<vmem>>, %arg3: memref<1x2xf32, #tpu.memory_space<vmem>>, %arg4: memref<2x4xf32, #tpu.memory_space<vmem>>, %arg5: memref<1x4xf32, #tpu.memory_space<vmem>>, %arg6: memref<1x4x256xf32, #tpu.memory_space<vmem>>) attributes {dimension_semantics = [#tpu.dimension_semantics<parallel>], iteration_bounds = array<i64: 2>, scalar_prefetch = 0 : i64, scratch_operands = 0 : i64, tpu.core_type = #tpu.core_type<tc>, window_params = [{transform_indices = @transform_0, window_bounds = array<i64: 1, 4, 256>}, {pipeline_mode = #tpu.pipeline_mode<synchronous>, transform_indices = @transform_1, window_bounds = array<i64: 4, 2>}, {pipeline_mode = #tpu.pipeline_mode<synchronous>, transform_indices = @transform_2, window_bounds = array<i64: 1, 2>}, {pipeline_mode = #tpu.pipeline_mode<synchronous>, transform_indices = @transform_3, window_bounds = array<i64: 2, 4>}, {pipeline_mode = #tpu.pipeline_mode<synchronous>, transform_indices = @transform_4, window_bounds = array<i64: 1, 4>}, {transform_indices = @transform_5, window_bounds = array<i64: 1, 4, 256>}]} {
    %c0 = arith.constant 0 : index
    %c0_0 = arith.constant 0 : index
    %c0_1 = arith.constant 0 : index
    %0 = vector.load %arg1[%c0, %c0_0, %c0_1] : memref<1x4x256xf32, #tpu.memory_space<vmem>>, vector<1x4x256xf32>
    %cst = arith.constant dense<0.000000e+00> : vector<1x4xf32>
    %1 = vector.multi_reduction <add>, %0, %cst [2] : vector<1x4x256xf32> to vector<1x4xf32>
    %cst_2 = arith.constant 3.906250e-03 : f32
    %2 = vector.broadcast %cst_2 : f32 to vector<1x4xf32>
    %3 = arith.mulf %1, %2 : vector<1x4xf32>
    %c0_3 = arith.constant 0 : index
    %c0_4 = arith.constant 0 : index
    %4 = vector.load %arg2[%c0_3, %c0_4] : memref<4x2xf32, #tpu.memory_space<vmem>>, vector<4x2xf32>
    %cst_5 = arith.constant dense<0.000000e+00> : vector<1x2xf32>
    %5 = tpu.matmul %3, %4, %cst_5 {dimension_numbers = #tpu.dot_dimension_numbers<[1], [0], [0], [1], [0, 0, 1, 1], [], []>} : vector<1x4xf32>, vector<4x2xf32>, vector<1x2xf32> -> vector<1x2xf32>
    %c0_6 = arith.constant 0 : index
    %c0_7 = arith.constant 0 : index
    %6 = vector.load %arg3[%c0_6, %c0_7] : memref<1x2xf32, #tpu.memory_space<vmem>>, vector<1x2xf32>
    %7 = arith.addf %5, %6 : vector<1x2xf32>
    %cst_8 = arith.constant 0.000000e+00 : f32
    %8 = vector.broadcast %cst_8 : f32 to vector<1x2xf32>
    %9 = arith.maximumf %7, %8 : vector<1x2xf32>
    %c0_9 = arith.constant 0 : index
    %c0_10 = arith.constant 0 : index
    %10 = vector.load %arg4[%c0_9, %c0_10] : memref<2x4xf32, #tpu.memory_space<vmem>>, vector<2x4xf32>
    %cst_11 = arith.constant dense<0.000000e+00> : vector<1x4xf32>
    %11 = tpu.matmul %9, %10, %cst_11 {dimension_numbers = #tpu.dot_dimension_numbers<[1], [0], [0], [1], [0, 0, 1, 1], [], []>} : vector<1x2xf32>, vector<2x4xf32>, vector<1x4xf32> -> vector<1x4xf32>
    %c0_12 = arith.constant 0 : index
    %c0_13 = arith.constant 0 : index
    %12 = vector.load %arg5[%c0_12, %c0_13] : memref<1x4xf32, #tpu.memory_space<vmem>>, vector<1x4xf32>
    %13 = arith.addf %11, %12 : vector<1x4xf32>
    %14 = arith.negf %13 : vector<1x4xf32>
    %15 = math.exp %14 : vector<1x4xf32>
    %cst_14 = arith.constant 1.000000e+00 : f32
    %16 = vector.broadcast %cst_14 : f32 to vector<1x4xf32>
    %17 = arith.addf %16, %15 : vector<1x4xf32>
    %18 = arith.divf %16, %17 : vector<1x4xf32>
    %19 = vector.shape_cast %18 : vector<1x4xf32> to vector<1x4x1xf32>
    %c0_15 = arith.constant 0 : index
    %c0_16 = arith.constant 0 : index
    %c0_17 = arith.constant 0 : index
    %20 = vector.load %arg1[%c0_15, %c0_16, %c0_17] : memref<1x4x256xf32, #tpu.memory_space<vmem>>, vector<1x4x256xf32>
    %21 = vector.broadcast %19 : vector<1x4x1xf32> to vector<1x4x256xf32>
    %22 = arith.mulf %21, %20 : vector<1x4x256xf32>
    %c0_18 = arith.constant 0 : index
    %c0_19 = arith.constant 0 : index
    %c0_20 = arith.constant 0 : index
    %23 = vector.load %arg6[%c0_18, %c0_19, %c0_20] : memref<1x4x256xf32, #tpu.memory_space<vmem>>, vector<1x4x256xf32>
    tpu.vector_store %arg6[%c0_18, %c0_19, %c0_20], %22 {strides = array<i32>} : memref<1x4x256xf32, #tpu.memory_space<vmem>>, vector<1x4x256xf32>,
    return
  }
  func.func @transform_0(%arg0: i32) -> (i32, i32, i32) {
    %c0_i32 = arith.constant 0 : i32
    %c0_i32_0 = arith.constant 0 : i32
    %c0_i32_1 = arith.constant 0 : i32
    return %arg0, %c0_i32, %c0_i32_0 : i32, i32, i32
  }
  func.func @transform_1(%arg0: i32) -> (i32, i32) {
    %c0_i32 = arith.constant 0 : i32
    %c0_i32_0 = arith.constant 0 : i32
    %c0_i32_1 = arith.constant 0 : i32
    return %c0_i32, %c0_i32_0 : i32, i32
  }
  func.func @transform_2(%arg0: i32) -> (i32, i32) {
    %c0_i32 = arith.constant 0 : i32
    %c0_i32_0 = arith.constant 0 : i32
    %c0_i32_1 = arith.constant 0 : i32
    return %c0_i32, %c0_i32_0 : i32, i32
  }
  func.func @transform_3(%arg0: i32) -> (i32, i32) {
    %c0_i32 = arith.constant 0 : i32
    %c0_i32_0 = arith.constant 0 : i32
    %c0_i32_1 = arith.constant 0 : i32
    return %c0_i32, %c0_i32_0 : i32, i32
  }
  func.func @transform_4(%arg0: i32) -> (i32, i32) {
    %c0_i32 = arith.constant 0 : i32
    %c0_i32_0 = arith.constant 0 : i32
    %c0_i32_1 = arith.constant 0 : i32
    return %c0_i32, %c0_i32_0 : i32, i32
  }
  func.func @transform_5(%arg0: i32) -> (i32, i32, i32) {
    %c0_i32 = arith.constant 0 : i32
    %c0_i32_0 = arith.constant 0 : i32
    %c0_i32_1 = arith.constant 0 : i32
    return %arg0, %c0_i32, %c0_i32_0 : i32, i32, i32
  }
}

</mosaic_0001>

<bundles_post_ra>
// kernel: tpu_custom_call.1
= control target key start
LH: loop header
LB: loop body
LE: loop exit
PB: predicated region body
PF: predicated region fallthrough
CT: control target
= control target key end

     0   :  { %10 = vsyncpa [#allocation3], 0  ;;  %s896_s0 = inlined_call_operand.hbm [shape: f32[2,4,256], index: 0, kind: input, shape index: {}]   ;;  %s897_s1 = inlined_call_operand.vmem [shape: f32[4,2], index: 1, kind: input, shape index: {}]   ;;  %s898_s2 = inlined_call_operand.vmem [shape: f32[1,2], index: 2, kind: input, shape index: {}]   ;;  %s899_s3 = inlined_call_operand.vmem [shape: f32[2,4], index: 3, kind: input, shape index: {}]   ;;  %s900_s4 = inlined_call_operand.vmem [shape: f32[1,4], index: 4, kind: input, shape index: {}]   ;;  %s901_s5 = inlined_call_operand.hbm [shape: f32[2,4,256], index: 5, kind: output, shape index: {}]  }
   0x1   :  { %12 = vsyncpa [#allocation3 + $0x1], 0 }
   0x2   :  { %13 = vsyncpa [#allocation4], 0 }
   0x3   :  { %15 = vsyncpa [#allocation4 + $0x1], 0  ;;  %s739_s18 = smov 0   ;;  %s741_s19 = smov 0  }
   0x4   :  { %s743_s20 = smov 0   ;;  %s745_s21 = smov 0  }
   0x5 LB: > { %s760_s22 = sadd.s32 4294967295, %s703_s21   ;;  %s523_s23 = sadd.s32 4294967294, %s703_s21   ;;  %s703_s21 = sphi %s745_s21, %s918_s21   ;;  %s699_s20 = sphi %s743_s20, %s917_s20   ;;  %s695_s19 = sphi %s741_s19, %s916_s19   ;;  %s691_s18 = sphi %s739_s18, %s915_s18  }
   0x6   : > { %s764_s24 = sadd.s32 1, %s703_s21   ;;  %s28_s25 = sadd.s32 1, %s699_s20 }
   0x7   : > { %s25_s26 = ssub.s32 %s703_s21, %s764_s24  ;;  %p35_p0 = scmp.ne.s32.totalorder %s699_s20, %s695_s19 }
   0x8   : > { %p26_p1 = scmp.eq.s32.totalorder %s25_s26, 0  ;;  %p36_p2 = scmp.eq.s32.totalorder %s703_s21, 0 }
   0x9   : > { %p41_p3 = scmp.ne.s32.totalorder %s695_s19, %s691_s18  ;;  %p42_p4 = scmp.eq.s32.totalorder %s760_s22, 0 }
   0xa   : > { %s776_s27 = scalar_select %p26_p1, %s699_s20, %s28_s25  }
   0xb   : > { %p778_p5 = por %p36_p2, %p35_p0  ;;  %p782_p6 = por %p42_p4, %p41_p3 }
   0xc   : > { %p149_p7 = scmp.eq.s32.totalorder %s760_s22, 1  ;;  %p155_p8 = scmp.eq.s32.totalorder %s523_s23, 1 }
   0xd   : > { %s905_s29 = scalar_select %p782_p6, 1, 0 }
   0xe   : > { %p570_p10 = scmp.lt.s32.totalorder %s703_s21, 2  ;;  %p789_p11 = por %p149_p7, %p35_p0 }
   0xf   : > { %p793_p12 = por %p155_p8, %p41_p3  ;;  %s187_s7 = sand.u32 1, %s699_s20  }
  0x10   : > { %s906_s30 = scalar_select %p789_p11, 1, 0 }
  0x11   : > { %s907_s6 = scalar_select %p793_p12, 1, 0 }
  0x12   : > { %s542_s8 = sshll.u32 %s703_s21, 7  ;;  %s526_s9 = sshll.u32 %s187_s7, 3 }
  0x13   : > { %s802_s12 = scalar_lea.hbm %s896_s0, %s542_s8  ;;  %s191_s13 = scalar_lea.vmem [#allocation2], %s526_s9 }
  0x14   : > { %s199_s14 = sshll.u32 %s191_s13, 4  ;;  %p806_p13 = pnand %p570_p10, %p778_p5  ;;  %s810_s14 = int_to_ptr.vmem [resolvable:$true] %s199_s14 }
  0x15   : > { %s188_s16 = scalar_lea.sflag [#allocation3], %s187_s7  ;;  %s611_s17 = scalar_lea.hbm %s802_s12, 128 }
  0x16   : > { %p612_p2 = scmp.ne.s32.totalorder %s802_s12, %s611_s17  ;;  %p613_p3 = pneg %p806_p13 }
  0x17   : > { %s616_s26 = scalar_lea.hbm %s896_s0, 256  ;;  %p617_p5 = scmp.lt.s32.totalorder %s802_s12, %s896_s0 }
  0x18   : > { %p614_p4 = pnand %p613_p3, %p612_p2  ;;  %p618_p8 = scmp.lt.s32.totalorder %s616_s26, %s611_s17 }
  0x1a   : > { %p615_p7 = pneg %p614_p4  ;;  %p619_p10 = por %p618_p8, %p617_p5 }
  0x1c   : > { %p620_p9 = pnand %p619_p10, %p615_p7 }
  0x1e   : > { %623 = shalt.err (!%p620_p9)
}
  0x1f   : > { %s624_s7 = scalar_lea.vmem %s810_s14, 128  ;;  %s705_s9 = smov [#allocation2]  }
  0x20   : > { %p625_p0 = scmp.ne.s32.totalorder %s810_s14, %s624_s7  ;;  %s629_s10 = sshll.u32 %s705_s9, 4  ;;  %s630_s10 = int_to_ptr.vmem [resolvable:$false] %s629_s10 }
  0x21   : > { %s631_s11 = scalar_lea.vmem %s630_s10, 256  ;;  %p632_p4 = scmp.lt.s32.totalorder %s810_s14, %s630_s10 }
  0x22   : > { %p627_p1 = pnand %p625_p0, %p613_p3  ;;  %p633_p12 = scmp.lt.s32.totalorder %s631_s11, %s624_s7 }
  0x24   : > { %p628_p2 = pneg %p627_p1  ;;  %p634_p11 = por %p633_p12, %p632_p4 }
  0x26   : > { %p635_p6 = pnand %p634_p11, %p628_p2 }
  0x28   : > { %638 = shalt.err (!%p635_p6)
}
  0x29   : > { %565 = dma.hbm_to_vmem [thread:$0]  (!%p806_p13), %s802_s12, 128, %s810_s14, %s188_s16  }
  0x2a   : > { %p909_p9 = scmp.lt.s32.totalorder %s703_s21, 3  ;;  %p910_p7 = scmp.ge.s32.totalorder %s703_s21, 1 }
  0x2c   : > { %p205_p0 = pnand %p910_p7, %p909_p9 }
  0x2d   : > { %s837_s13 = sand.u32 (!%p205_p0), 1, %s695_s19   ;;  %p911_p6 = scmp.ne.s32.totalorder (!%p205_p0), %s905_s29, 0 }
  0x2e   : > { %208 = sbr.rel (%p205_p0) target bundleno = 758 (0x2f6), region = 40  ;;  %s530_s17 = sshll.u32 (!%p205_p0), %s837_s13, 3 }
  0x2f   : > { %s211_s23 = scalar_lea.sflag (!%p205_p0), [#allocation3], %s837_s13  ;;  %s214_s15 = scalar_lea.vmem (!%p205_p0), [#allocation2], %s530_s17 }
  0x33   : > { %682 = dma.done.wait (%p911_p6), %s211_s23, 128  }
  0x34   : > { %684 = vsyncadd (%p911_p6), %s211_s23, 4294967168  ;;  %vm245_vm0 = vcmask 1043456   ;;  %v241_v0 = vld [vmem:[%s214_s15] sm:$0xff]  ;;  %v706_v5 = vmov 0.0   ;;  %vm707_vm1 = vmmov 0   ;;  %v255_v7 = vlaneseq  ;;  %s543_s7 = sshll.u32 %s760_s22, 7 }
  0x35   : > { %v243_v1 = vcombine.high %v241_v0, %v241_v0  ;;  %v246_v2 = vsel %vm245_vm0, %v241_v0, 0.0  ;;  %548 = vmatprep.subr.mxu0 %v706_v5  ;;  %v252_v6 = vld [vmem:[%s897_s1] sm:$0xf]  ;;  %553 = vmatprep.subr.mxu1 %v706_v5  ;;  %vm261_vm2 = vcmask 31744   ;;  %vm344_vm3 = vcmask 1041408   ;;  %s240_s9 = scalar_lea.vmem [#allocation5], %s530_s17  ;;  %s451_s15 = scalar_lea.hbm %s901_s5, %s543_s7 }
  0x36   : > { %549 = vmatpush3.msk.msra.mxu0 %vm245_vm0, %v252_v6  ;;  %550 = vmatprep.mubr.msk.f32.mxu0 %vm707_vm1, %v706_v5  ;;  %v256_v8 = vand.u32 127, %v255_v7  ;;  %v258_v9 = vshrl.u32 %v255_v7, 7  ;;  %v338_v14 = vld [vmem:[%s899_s3] sm:$0x3]  ;;  %vm340_vm4 = vcmask 15360   ;;  %s453_s10 = sshll.u32 %s240_s9, 4  ;;  %s454_s10 = int_to_ptr.vmem [resolvable:$true] %s453_s10 }
  0x37   : > { %v247_v3 = vsel %vm245_vm0, %v243_v1, 0.0  ;;  %555 = vmatprep.mubr.msk.f32.mxu1 %vm707_vm1, %v706_v5  ;;  %554 = vmatpush3.msk.msra.mxu1 %vm344_vm3, %v338_v14  ;;  %v253_v15 = vld [vmem:[%s898_s2] sm:$0x1]  ;;  %s439_s12 = scalar_lea.sflag [#allocation4], %s837_s13  ;;  %s639_s14 = scalar_lea.vmem %s454_s10, 128 }
  0x38   : > { %v248_v4 = vadd.f32 %v247_v3, %v246_v2  ;;  %v259_v10 = vsub.s32 %v256_v8, %v258_v9  ;;  %v339_v20 = vld [vmem:[%s900_s4] sm:$0x1]  ;;  %v426_v27 = vsub.s32 0, %v258_v9  ;;  %p640_p11 = scmp.ne.s32.totalorder %s454_s10, %s639_s14  ;;  %p912_p12 = scmp.ne.s32.totalorder %s906_s30, 0 }
  0x39   : > { %s708_s29 = smov [#allocation5]  }
  0x3a   : > { %249 = vadd.xlane.f32.xlu0 %v248_v4  ;;  %p641_p13 = pnand %p640_p11, %p912_p12  ;;  %s643_s22 = sshll.u32 %s708_s29, 4  ;;  %s644_s22 = int_to_ptr.vmem [resolvable:$false] %s643_s22 }
  0x3b   : > { %s645_s17 = scalar_lea.vmem %s644_s22, 256  ;;  %p646_p3 = scmp.lt.s32.totalorder %s454_s10, %s644_s22 }
  0x3c   : > { %p642_p1 = pneg %p641_p13  ;;  %p647_p5 = scmp.lt.s32.totalorder %s645_s17, %s639_s14 }
  0x3e   : > { %p648_p8 = por %p647_p5, %p646_p3 }
  0x40   : > { %p649_p10 = pnand %p648_p8, %p642_p1 }
  0xc3   : > { %v250_v11 = vpop.xlane.xlu0 %249 }
  0xc4   : > { %v251_v12 = vmul.f32 0.00390625, %v250_v11 }
  0xc6   : > { %v260_v13 = vrot.slane %v251_v12, %v259_v10 }
  0xc8   : > { %551 = vmatmul.mubr.msk.f32.vlgmr.msra.gmra.mxu0 %vm261_vm2, %v260_v13 }
 0x188   : > { %v333_v16 = vpop.f32.mrf.mxu0 }
 0x189   : > { %v334_v17 = vadd.f32 %v333_v16, %v253_v15 }
 0x18a   : > { %v552_v18 = vpop.f32.mrf.mxu0 }
 0x18b   : > { %v337_v19 = vmax.f32 %v334_v17, 0.0 }
 0x18d   : > { %556 = vmatmul.mubr.msk.f32.vlgmr.msra.gmra.mxu1 %vm340_vm4, %v337_v19 }
 0x24d   : > { %v414_v21 = vpop.f32.mrf.mxu1 }
 0x24e   : > { %v415_v22 = vadd.f32 %v414_v21, %v339_v20 }
 0x24f   : > { %v557_v23 = vpop.f32.mrf.mxu1 }
 0x250   : > { %v536_v24 = vmul.f32 -1.442695, %v415_v22 }
 0x252   : > { %607 = vpow2.f32 %v536_v24 }
 0x25f   : > { %v608_v25 = vpop.eup %607 }
 0x260   : > { %v421_v26 = vadd.f32 1.0, %v608_v25 }
 0x262   : > { %609 = vrcp.f32 %v421_v26 }
 0x26f   : > { %v610_v28 = vpop.eup %609 }
 0x270   : > { %v427_v29 = vrot.slane %v610_v28, %v426_v27 }
 0x272   : > { %429 = vbcast.lane.b32.xlu0 %v427_v29, 256 }
 0x2e4   : > { %v430_v30 = vpop.permute.xlu0 %429 }
 0x2e5   : > { %v431_v31 = vmul.f32 %v430_v30, %v241_v0  ;;  %v432_v32 = vmul.f32 %v430_v30, %v243_v1 }
 0x2e7   : > { %v435_v33 = vcombine.low %v431_v31, %v432_v32 }
 0x2e9   : > { %437 = vst [vmem:[%s240_s9] sm:$0xff] %v435_v33 }
 0x2ea   : > { %652 = shalt.err (!%p649_p10)
}
 0x2eb   : > { %s653_s16 = scalar_lea.hbm %s451_s15, 128  ;;  %s657_s26 = scalar_lea.hbm %s901_s5, 256 }
 0x2ec   : > { %p654_p2 = scmp.ne.s32.totalorder %s451_s15, %s653_s16  ;;  %p658_p7 = scmp.lt.s32.totalorder %s451_s15, %s901_s5 }
 0x2ed   : > { %p659_p0 = scmp.lt.s32.totalorder %s657_s26, %s653_s16 }
 0x2ee   : > { %p655_p4 = pnand %p654_p2, %p912_p12 }
 0x2ef   : > { %p660_p6 = por %p659_p0, %p658_p7 }
 0x2f0   : > { %p656_p9 = pneg %p655_p4 }
 0x2f2   : > { %p661_p11 = pnand %p660_p6, %p656_p9 }
 0x2f4   : > { %664 = shalt.err (!%p661_p11)
}
 0x2f5   : > { %560 = dma.vmem_to_hbm [thread:$0]  (%p912_p12), %s454_s10, 128, %s451_s15, %s439_s12  }
 0x2f6 PF: > { %s465_s7 = sand.u32 1, %s691_s18   ;;  %p913_p13 = scmp.ne.s32.totalorder %s907_s6, 0 }
 0x2f7   : > { %p914_p1 = scmp.ge.s32.totalorder %s703_s21, 2  ;;  %s466_s9 = scalar_lea.sflag [#allocation4], %s465_s7 }
 0x2f9   : > { %p567_p3 = pnand %p914_p1, %p913_p13 }
 0x2fb   : > { %p568_p5 = pneg %p567_p3 }
 0x2fd   : > { %686 = dma.done.wait (%p568_p5), %s466_s9, 128  }
 0x2fe   : > { %688 = vsyncadd (%p568_p5), %s466_s9, 4294967168  ;;  %p18_p8 = scmp.ge.s32.totalorder %s764_s24, 4   ;;  %s915_s18 = smov %s695_s19 }
 0x2ff   : > { %s916_s19 = smov %s699_s20  ;;  %s917_s20 = smov %s776_s27 }
 0x300   : > { %s918_s21 = smov %s764_s24  ;;  %20 = sbr.rel (!%p18_p8) target bundleno = 5 (0x5), region = 85 }
 0x305   :  { %471 = vsyncpa [#allocation3], 1 }
 0x306   :  { %473 = vsyncpa [#allocation3 + $0x1], 1 }
 0x307   :  { %474 = vsyncpa [#allocation4], 1 }
 0x308   :  { %476 = vsyncpa [#allocation4 + $0x1], 1 }

</bundles_post_ra>
